<compile_context>
chip_gen: v6e
topology: v6e:2x2x1
jax: 0.10.0
libtpu: 0.0.40
codegen_flags: <defaults>
</compile_context>

<pallas_src>
import jax
import jax.numpy as jnp
from jax import lax
from jax.experimental import pallas as pl
from jax.experimental.pallas import tpu as pltpu


def _fused_kernel(x_ref, w_ref, bias_ref, out_ref):
    x = x_ref[...].astype(jnp.float32)

    # F.normalize(x, p=2, dim=1, eps=1e-12): x * (1 / max(||x||, 1e-12)).
    # rsqrt(max(sq, 1e-24)) == 1 / max(sqrt(sq), 1e-12); runs on the EUP.
    sq = jnp.sum(x * x, axis=-1, keepdims=True)
    inv_norm = lax.rsqrt(jnp.maximum(sq, 1e-24))
    xn = (x * inv_norm).astype(jnp.bfloat16)  # bf16 MXU operand, f32 accumulate

    # Single wide bf16 MXU matmul over all 6 output blocks (bottleneck + 5
    # heads, 1/temp already folded into the head columns at prep time).
    y = jnp.dot(xn, w_ref[...], preferred_element_type=jnp.float32)

    # Bias only populates the bottleneck columns; head/pad columns are zero.
    out_ref[...] = (y + bias_ref[...]).astype(out_ref.dtype)


def prepare_params(params, temp=0.05, n_heads=5):
    """One-time weight fusion, hoisted out of the per-call forward.

    * concat bottleneck + 5 heads along the output (lane) axis,
    * fold 1/temp into the head columns,
    * zero-pad N and D to multiples of 128 (lane-dense stores / loads, full
      MXU contraction; 256+5*12=316 -> 384 = 1.5x256, fine for v6e/v7x MXU),
    * cast the fused weight to bf16 (MXU-native on v5e/v6e/v7x).
    """
    wb = params["wb"].astype(jnp.float32)
    D, bottleneck_dim = wb.shape
    heads = [params[f"w{i}"].astype(jnp.float32) / temp for i in range(1, n_heads + 1)]
    num_classes = heads[0].shape[1]

    w_cat = jnp.concatenate([wb] + heads, axis=1)
    n_total = bottleneck_dim + n_heads * num_classes
    n_pad = ((n_total + 127) // 128) * 128
    d_pad = ((D + 127) // 128) * 128
    w_cat = jnp.pad(w_cat, ((0, d_pad - D), (0, n_pad - n_total))).astype(jnp.bfloat16)

    bias = jnp.concatenate(
        [params["bb"].reshape(1, bottleneck_dim).astype(jnp.float32),
         jnp.zeros((1, n_pad - bottleneck_dim), jnp.float32)], axis=1)

    return {
        "w": w_cat,                    # [d_pad, n_pad] bf16
        "bias": bias,                  # [1, n_pad]     f32
        "input_size": D, "d_pad": d_pad,
        "bottleneck_dim": bottleneck_dim, "num_classes": num_classes,
        "n_heads": n_heads, "n_total": n_total, "n_pad": n_pad,
        "temp": temp,
    }


def _choose_batch_tile(B, batch_tile):
    """Pick a batch tile that minimizes padding and gives >=2 grid steps
    (so v7x's second TensorCore isn't idle) whenever B >= 16."""
    n_steps = max(1, -(-B // batch_tile))
    if n_steps == 1 and B >= 16:
        n_steps = 2
    bt = -(-B // n_steps)
    bt = ((bt + 7) // 8) * 8
    return bt


def res_classifier_mme_forward_fused(x, prep, batch_tile=512):
    """Returns the fused, lane-dense [B, n_pad] output buffer.
    Column layout: [0:bd) = feature, [bd + i*C : bd + (i+1)*C) = head i."""
    B, D = x.shape
    assert D == prep["input_size"]
    d_pad, n_pad = prep["d_pad"], prep["n_pad"]

    if d_pad != D:
        # TODO(synk): for non-128-multiple input_size this zero-column pad of x
        # costs an extra HBM pass; pad once at feature-extraction time instead.
        x = jnp.pad(x, ((0, 0), (0, d_pad - D)))

    bt = _choose_batch_tile(B, batch_tile)
    n_steps = -(-B // bt)
    grid = (n_steps,)

    # Explicit scoped-VMEM budget (x tile + out tile double-buffered, weight /
    # bias single-buffered but counted twice for slack), capped for v7x.
    x_bytes = bt * d_pad * 4
    w_bytes = d_pad * n_pad * 2
    b_bytes = n_pad * 4
    out_bytes = bt * n_pad * 4
    vmem_need = 2 * (x_bytes + out_bytes) + 2 * (w_bytes + b_bytes) + (8 << 20)
    vmem_limit = int(min(max(vmem_need, 32 << 20), 64 << 20))

    cost = pl.CostEstimate(
        flops=2 * n_steps * bt * d_pad * n_pad,
        transcendentals=n_steps * bt,
        bytes_accessed=n_steps * bt * d_pad * 4 + w_bytes + b_bytes
        + n_steps * bt * n_pad * 4,
    )

    return pl.pallas_call(
        _fused_kernel,
        out_shape=jax.ShapeDtypeStruct((B, n_pad), jnp.float32),
        grid=grid,
        in_specs=[
            # x tile: pipelined / sharded across TCs.
            pl.BlockSpec((bt, d_pad), lambda i: (i, 0)),
            # fused bf16 weight: VMEM-resident, single-buffered (never re-DMAs).
            pl.BlockSpec((d_pad, n_pad), lambda i: (0, 0),
                         pipeline_mode=pl.Buffered(buffer_count=1)),
            # per-column bias: resident, single-buffered.
            pl.BlockSpec((1, n_pad), lambda i: (0, 0),
                         pipeline_mode=pl.Buffered(buffer_count=1)),
        ],
        out_specs=pl.BlockSpec((bt, n_pad), lambda i: (i, 0)),
        compiler_params=pltpu.CompilerParams(
            dimension_semantics=("parallel",),
            vmem_limit_bytes=vmem_limit,
        ),
        cost_estimate=cost,
    )(x, prep["w"], prep["bias"])


def res_classifier_mme_forward(x, prep, batch_tile=512):
    """Module-equivalent forward: (feature, x1, x2, x3, x4, x5).
    Call under jit so the column slices fuse with downstream consumers."""
    out = res_classifier_mme_forward_fused(x, prep, batch_tile=batch_tile)
    bd, C, nh = prep["bottleneck_dim"], prep["num_classes"], prep["n_heads"]
    feature = out[:, :bd]
    heads = tuple(out[:, bd + i * C: bd + (i + 1) * C] for i in range(nh))
    return (feature,) + heads


def init_params(key, input_size, num_classes=12, bottleneck_dim=256):
    """Deterministic init mimicking weights_init: N(0, 0.1). Weights stored [D, out]."""
    keys = jax.random.split(key, 7)
    p = {
        "wb": 0.1 * jax.random.normal(keys[0], (input_size, bottleneck_dim), jnp.float32),
        "bb": 0.1 * jax.random.normal(keys[1], (1, bottleneck_dim), jnp.float32),
    }
    for i, k in enumerate(keys[2:], start=1):
        p[f"w{i}"] = 0.1 * jax.random.normal(k, (input_size, num_classes), jnp.float32)
    return p


def _reference_forward(x, params, temp=0.05):
    # Pure-JAX f32 reference mirroring the PyTorch forward.
    norm = jnp.sqrt(jnp.sum(x * x, axis=-1, keepdims=True))
    xn = x / jnp.maximum(norm, 1e-12)
    feature = xn @ params["wb"] + params["bb"]
    outs = [feature]
    for i in range(1, 6):
        outs.append((xn @ params[f"w{i}"]) / temp)
    return tuple(outs)


# TODO(synk): `reverse=True` (GradReverse autograd Function), `weight_norm` and
# `weights_init` are training-time utilities, not part of the default forward.

if __name__ == "__main__":
    B = 8
    INPUT_SIZE = 128          # small but 128-aligned (module default is 2048)
    NUM_CLASSES = 12
    TEMP = 0.05

    key = jax.random.PRNGKey(0)
    k_x, k_p = jax.random.split(key)
    x = jax.random.normal(k_x, (B, INPUT_SIZE), jnp.float32)
    params = init_params(k_p, INPUT_SIZE, NUM_CLASSES)

    # Hoisted weight fusion: built once, reused by every forward call.
    prep = prepare_params(params, temp=TEMP)

    fwd = jax.jit(lambda xx: res_classifier_mme_forward(xx, prep))
    outs = jax.block_until_ready(fwd(x))

    refs = _reference_forward(x, params, temp=TEMP)
    for o, r in zip(outs, refs):
        assert o.shape == r.shape and o.dtype == r.dtype
        # bf16 MXU operands (f32 accumulate): ~1e-2 relative error vs f32 ref.
        assert jnp.allclose(o, r, atol=5e-2, rtol=5e-2), float(jnp.max(jnp.abs(o - r)))

    print("KERNEL_OK")
</pallas_src>

<mosaic_0001>
module attributes {stable_mosaic.version = 11 : i64} {
  func.func @_fused_kernel(%arg0: i32, %arg1: memref<8x128xf32, #tpu.memory_space<vmem>>, %arg2: memref<128x384xbf16, #tpu.memory_space<vmem>>, %arg3: memref<1x384xf32, #tpu.memory_space<vmem>>, %arg4: memref<8x384xf32, #tpu.memory_space<vmem>>) attributes {dimension_semantics = [#tpu.dimension_semantics<parallel>], iteration_bounds = array<i64: 1>, scalar_prefetch = 0 : i64, scratch_operands = 0 : i64, tpu.core_type = #tpu.core_type<tc>, window_params = [{transform_indices = @transform_0, window_bounds = array<i64: 8, 128>}, {pipeline_mode = #tpu.pipeline_mode<synchronous>, transform_indices = @transform_1, window_bounds = array<i64: 128, 384>}, {pipeline_mode = #tpu.pipeline_mode<synchronous>, transform_indices = @transform_2, window_bounds = array<i64: 1, 384>}, {transform_indices = @transform_3, window_bounds = array<i64: 8, 384>}]} {
    %c0 = arith.constant 0 : index
    %c0_0 = arith.constant 0 : index
    %0 = vector.load %arg1[%c0, %c0_0] : memref<8x128xf32, #tpu.memory_space<vmem>>, vector<8x128xf32>
    %1 = arith.mulf %0, %0 : vector<8x128xf32>
    %cst = arith.constant dense<0.000000e+00> : vector<8xf32>
    %2 = vector.multi_reduction <add>, %1, %cst [1] : vector<8x128xf32> to vector<8xf32>
    %3 = vector.shape_cast %2 : vector<8xf32> to vector<8x1xf32>
    %cst_1 = arith.constant 1.000000e-24 : f32
    %4 = vector.broadcast %cst_1 : f32 to vector<8x1xf32>
    %5 = arith.maximumf %3, %4 : vector<8x1xf32>
    %6 = math.rsqrt %5 : vector<8x1xf32>
    %7 = vector.broadcast %6 : vector<8x1xf32> to vector<8x128xf32>
    %8 = arith.mulf %0, %7 : vector<8x128xf32>
    %9 = arith.truncf %8 : vector<8x128xf32> to vector<8x128xbf16>
    %c0_2 = arith.constant 0 : index
    %c0_3 = arith.constant 0 : index
    %10 = vector.load %arg2[%c0_2, %c0_3] : memref<128x384xbf16, #tpu.memory_space<vmem>>, vector<128x384xbf16>
    %cst_4 = arith.constant dense<0.000000e+00> : vector<8x384xf32>
    %11 = tpu.matmul %9, %10, %cst_4 {dimension_numbers = #tpu.dot_dimension_numbers<[1], [0], [0], [1], [0, 0, 1, 1], [], []>} : vector<8x128xbf16>, vector<128x384xbf16>, vector<8x384xf32> -> vector<8x384xf32>
    %c0_5 = arith.constant 0 : index
    %c0_6 = arith.constant 0 : index
    %12 = vector.load %arg3[%c0_5, %c0_6] : memref<1x384xf32, #tpu.memory_space<vmem>>, vector<1x384xf32>
    %13 = vector.broadcast %12 : vector<1x384xf32> to vector<8x384xf32>
    %14 = arith.addf %11, %13 : vector<8x384xf32>
    %c0_7 = arith.constant 0 : index
    %c0_8 = arith.constant 0 : index
    %15 = vector.load %arg4[%c0_7, %c0_8] : memref<8x384xf32, #tpu.memory_space<vmem>>, vector<8x384xf32>
    tpu.vector_store %arg4[%c0_7, %c0_8], %14 {strides = array<i32>} : memref<8x384xf32, #tpu.memory_space<vmem>>, vector<8x384xf32>,
    return
  }
  func.func @transform_0(%arg0: i32) -> (i32, i32) {
    %c0_i32 = arith.constant 0 : i32
    %c0_i32_0 = arith.constant 0 : i32
    return %arg0, %c0_i32 : i32, i32
  }
  func.func @transform_1(%arg0: i32) -> (i32, i32) {
    %c0_i32 = arith.constant 0 : i32
    %c0_i32_0 = arith.constant 0 : i32
    %c0_i32_1 = arith.constant 0 : i32
    return %c0_i32, %c0_i32_0 : i32, i32
  }
  func.func @transform_2(%arg0: i32) -> (i32, i32) {
    %c0_i32 = arith.constant 0 : i32
    %c0_i32_0 = arith.constant 0 : i32
    %c0_i32_1 = arith.constant 0 : i32
    return %c0_i32, %c0_i32_0 : i32, i32
  }
  func.func @transform_3(%arg0: i32) -> (i32, i32) {
    %c0_i32 = arith.constant 0 : i32
    %c0_i32_0 = arith.constant 0 : i32
    return %arg0, %c0_i32 : i32, i32
  }
}

</mosaic_0001>

<bundles_post_ra>
// kernel: _lambda_.1
= control target key start
LH: loop header
LB: loop body
LE: loop exit
PB: predicated region body
PF: predicated region fallthrough
CT: control target
= control target key end

     0   :  { %8 = vsyncpa [#allocation3], 0  ;;  %s537_s0 = inlined_call_operand.hbm [shape: f32[8,128], index: 0, kind: input, shape index: {}]   ;;  %s538_s1 = inlined_call_operand.hbm [shape: bf16[128,384], index: 1, kind: input, shape index: {}]   ;;  %s539_s2 = inlined_call_operand.hbm [shape: f32[1,384], index: 2, kind: input, shape index: {}]   ;;  %s540_s3 = inlined_call_operand.vmem [shape: f32[8,384], index: 3, kind: output, shape index: {}]  }
   0x1   :  { %9 = vsyncpa [#allocation5], 0  ;;  %s486_s12 = smov [#allocation4]  }
   0x2   :  { %s25_s13 = sshll.u32 %s486_s12, 4  ;;  %s26_s13 = int_to_ptr.vmem [resolvable:$true] %s25_s13 }
   0x3   :  { %s430_s14 = scalar_lea.vmem %s26_s13, 3072  ;;  %p435_p1 = scmp.lt.s32.totalorder %s26_s13, %s26_s13 }
   0x4   :  { %p431_p0 = scmp.ne.s32.totalorder %s26_s13, %s430_s14  ;;  %p436_p2 = scmp.lt.s32.totalorder %s430_s14, %s430_s14 }
   0x6   :  { %p437_p3 = por %p436_p2, %p435_p1 }
   0x8   :  { %p438_p4 = pnand %p437_p3, %p431_p0 }
   0xa   :  { %441 = shalt.err (!%p438_p4)
}
   0xb   :  { %s487_s15 = smov 192   ;;  %s488_s16 = smov 12  }
   0xc   :  { %31 = dma.hbm_to_vmem [thread:$0]  %s538_s1, 3072, %s26_s13, [#allocation5], %s487_s15, %s487_s15, %s488_s16  }
   0xd   :  { %s489_s19 = smov [#allocation2]   ;;  %s490_s21 = smov [#allocation6]  }
   0xe   :  { %s16_s20 = sshll.u32 %s489_s19, 4  ;;  %s38_s22 = sshll.u32 %s490_s21, 4  ;;  %s17_s20 = int_to_ptr.vmem [resolvable:$true] %s16_s20  ;;  %s39_s22 = int_to_ptr.vmem [resolvable:$true] %s38_s22 }
   0xf   :  { %s450_s23 = scalar_lea.vmem %s17_s20, 128  ;;  %p455_p6 = scmp.lt.s32.totalorder %s17_s20, %s17_s20 }
  0x10   :  { %p451_p5 = scmp.ne.s32.totalorder %s17_s20, %s450_s23  ;;  %p456_p7 = scmp.lt.s32.totalorder %s450_s23, %s450_s23 }
  0x12   :  { %p457_p8 = por %p456_p7, %p455_p6 }
  0x14   :  { %p458_p9 = pnand %p457_p8, %p451_p5 }
  0x16   :  { %461 = shalt.err (!%p458_p9)
}
  0x17   :  { %19 = dma.hbm_to_vmem [thread:$0]  %s537_s0, 128, %s17_s20, [#allocation3]  }
  0x18   :  { %s470_s26 = scalar_lea.vmem %s39_s22, 48  ;;  %s474_s1 = scalar_lea.vmem %s39_s22, 64 }
  0x19   :  { %p471_p10 = scmp.ne.s32.totalorder %s39_s22, %s470_s26  ;;  %p475_p11 = scmp.lt.s32.totalorder %s39_s22, %s39_s22 }
  0x1a   :  { %p476_p12 = scmp.lt.s32.totalorder %s474_s1, %s470_s26 }
  0x1c   :  { %p477_p13 = por %p476_p12, %p475_p11 }
  0x1e   :  { %p478_p0 = pnand %p477_p13, %p471_p10 }
  0x20   :  { %481 = shalt.err (!%p478_p0)
}
  0x21   :  { %41 = dma.hbm_to_vmem [thread:$0]  %s539_s2, 48, %s39_s22, [#allocation5]  }
  0x22   :  { %482 = dma.done.wait [#allocation3], 128  }
  0x23   :  { %483 = vsyncadd [#allocation3], 4294967168 }
  0x24   :  { %484 = dma.done.wait [#allocation5], 3120  }
  0x25   :  { %485 = vsyncadd [#allocation5], 4294964176  ;;  %v491_v0 = vmov 0.0   ;;  %v523_v1 = vld [vmem:[#allocation2] sm:$0xff]  ;;  %v390_v4 = vld [vmem:[#allocation4 + $0xa8] ss:$12 sps:$4 sm:$0xff]   ;;  %v94_v33 = vlaneseq }
  0x26   :  { %360 = vmatprep.subr.bf16.mxu1 %v491_v0  ;;  %v53_v2 = vmul.f32 %v523_v1, %v523_v1  ;;  %v388_v3 = vld [vmem:[#allocation4 + $0xac] ss:$12 sps:$4 sm:$0xff]   ;;  %v391_v5 = vld [vmem:[#allocation4 + $0xb0] ss:$12 sps:$4 sm:$0xff]   ;;  %v392_v6 = vld [vmem:[#allocation4 + $0x94] ss:$12 sps:$4 sm:$0xff]  }
  0x27   :  { %237 = vmatprep.subr.bf16.mxu0 %v388_v3  ;;  %v394_v7 = vld [vmem:[#allocation4 + $0x90] ss:$12 sps:$4 sm:$0xff]   ;;  %361 = vmatpush3.bf16.msra.mxu1 %v391_v5  ;;  %v395_v8 = vld [vmem:[#allocation4 + $0x98] ss:$12 sps:$4 sm:$0xff]   ;;  %v399_v11 = vld [vmem:[#allocation4 + $0x80] ss:$12 sps:$4 sm:$0xff]  }
  0x28   :  { %54 = vadd.xlane.f32.xlu0 %v53_v2  ;;  %238 = vmatpush1.bf16.msra.mxu0 %v390_v4  ;;  %v396_v9 = vld [vmem:[#allocation4 + $0x7c] ss:$12 sps:$4 sm:$0xff]   ;;  %v398_v10 = vld [vmem:[#allocation4 + $0x78] ss:$12 sps:$4 sm:$0xff]   ;;  %v402_v13 = vld [vmem:[#allocation4 + $0x60] ss:$12 sps:$4 sm:$0xff]  }
  0x29   :  { %239 = vmatprep.subr.bf16.mxu0 %v392_v6  ;;  %362 = vmatprep.subr.bf16.mxu1 %v491_v0  ;;  %v400_v12 = vld [vmem:[#allocation4 + $0x64] ss:$12 sps:$4 sm:$0xff]   ;;  %v403_v14 = vld [vmem:[#allocation4 + $0x68] ss:$12 sps:$4 sm:$0xff]   ;;  %v404_v15 = vld [vmem:[#allocation4 + $0x4c] ss:$12 sps:$4 sm:$0xff]  }
  0x2a   :  { %v406_v16 = vld [vmem:[#allocation4 + $0x48] ss:$12 sps:$4 sm:$0xff]   ;;  %v407_v17 = vld [vmem:[#allocation4 + $0x50] ss:$12 sps:$4 sm:$0xff]   ;;  %v411_v20 = vld [vmem:[#allocation4 + $0x38] ss:$12 sps:$4 sm:$0xff]  }
  0x2b   :  { %363 = vmatpush3.bf16.msra.mxu1 %v395_v8  ;;  %v408_v18 = vld [vmem:[#allocation4 + $0x34] ss:$12 sps:$4 sm:$0xff]   ;;  %v410_v19 = vld [vmem:[#allocation4 + $0x30] ss:$12 sps:$4 sm:$0xff]   ;;  %v492_v22 = vmov 0   ;;  %vm493_vm0 = vmmov 0  }
  0x2c   :  { %240 = vmatpush1.bf16.msra.mxu0 %v394_v7  ;;  %364 = vmatprep.subr.bf16.mxu1 %v491_v0  ;;  %v412_v21 = vld [vmem:[#allocation4 + $0x1c] ss:$12 sps:$4 sm:$0xff]   ;;  %v414_v23 = vld [vmem:[#allocation4 + $0x18] ss:$12 sps:$4 sm:$0xff]   ;;  %v415_v24 = vld [vmem:[#allocation4 + $0x20] ss:$12 sps:$4 sm:$0xff]  }
  0x2d   :  { %241 = vmatprep.subr.bf16.mxu0 %v396_v9  ;;  %269 = vmatprep.mubr.bf16.mxu0 %v492_v22  ;;  %v416_v25 = vld [vmem:[#allocation4 + $0x4] ss:$12 sps:$4 sm:$0xff]   ;;  %v418_v26 = vld [vmem:[#allocation4] ss:$12 sps:$4 sm:$0xff]   ;;  %v419_v27 = vld [vmem:[#allocation4 + $0x8] ss:$12 sps:$4 sm:$0xff]  }
  0x2e   :  { %376 = vmatprep.mubr.msk.bf16.mxu1 %vm493_vm0, %v491_v0  ;;  %v95_v34 = vshrl.u32 %v94_v33, 7  ;;  %v92_v37 = vld [vmem:[#allocation6] sm:$0x7] }
  0x2f   :  { %365 = vmatpush3.bf16.msra.mxu1 %v399_v11 }
  0x30   :  { %242 = vmatpush1.bf16.msra.mxu0 %v398_v10  ;;  %366 = vmatprep.subr.bf16.mxu1 %v491_v0  ;;  %v96_v35 = vsub.s32 0, %v95_v34  ;;  %v104_v36 = vsub.s32 2, %v95_v34  ;;  %v100_v38 = vsub.s32 1, %v95_v34 }
  0x31   :  { %243 = vmatprep.subr.bf16.mxu0 %v400_v12 }
  0x32   :  { %v97_v39 = vrot.slane %v92_v37, %v96_v35  ;;  %v105_v40 = vrot.slane %v92_v37, %v104_v36  ;;  %v101_v41 = vrot.slane %v92_v37, %v100_v38 }
  0x33   :  { %367 = vmatpush3.bf16.msra.mxu1 %v403_v14 }
  0x34   :  { %244 = vmatpush1.bf16.msra.mxu0 %v402_v13  ;;  %368 = vmatprep.subr.bf16.mxu1 %v491_v0 }
  0x35   :  { %245 = vmatprep.subr.bf16.mxu0 %v404_v15 }
  0x37   :  { %369 = vmatpush3.bf16.msra.mxu1 %v407_v17 }
  0x38   :  { %246 = vmatpush1.bf16.msra.mxu0 %v406_v16  ;;  %370 = vmatprep.subr.bf16.mxu1 %v491_v0 }
  0x39   :  { %247 = vmatprep.subr.bf16.mxu0 %v408_v18 }
  0x3b   :  { %371 = vmatpush3.bf16.msra.mxu1 %v411_v20 }
  0x3c   :  { %248 = vmatpush1.bf16.msra.mxu0 %v410_v19  ;;  %372 = vmatprep.subr.bf16.mxu1 %v491_v0 }
  0x3d   :  { %249 = vmatprep.subr.bf16.mxu0 %v412_v21 }
  0x3f   :  { %373 = vmatpush3.bf16.msra.mxu1 %v415_v24 }
  0x40   :  { %250 = vmatpush1.bf16.msra.mxu0 %v414_v23  ;;  %374 = vmatprep.subr.bf16.mxu1 %v491_v0 }
  0x41   :  { %251 = vmatprep.subr.bf16.mxu0 %v416_v25 }
  0x43   :  { %375 = vmatpush3.bf16.msra.mxu1 %v419_v27 }
  0x44   :  { %252 = vmatpush1.bf16.msra.mxu0 %v418_v26 }
  0xb1   :  { %v55_v28 = vpop.xlane.xlu0 %54 }
  0xb2   :  { %v56_v29 = vmax.f32 %v55_v28, 1e-24 }
  0xb4   :  { %420 = vrsqrt.f32 %v56_v29 }
  0xc1   :  { %v421_v30 = vpop.eup %420 }
  0xc2   :  { %v58_v31 = vmul.f32 %v421_v30, %v523_v1 }
  0xc4   :  { %v59_v32 = vpack.c.bf16 %v58_v31, %v58_v31 }
  0xc6   :  { %270 = vmatmul.mubr.bf16.vlgmr.msra.gmra.mxu0 %v59_v32  ;;  %377 = vmatmul.mubr.bf16.vlgmr.msra.gmra.mxu1 %v59_v32 }
 0x186   :  { %v271_v42 = vpop.f32.mrf.mxu0  ;;  %v312_v43 = vpop.f32.mrf.mxu1 }
 0x187   :  { %v272_v44 = vadd.f32 %v271_v42, %v97_v39  ;;  %v313_v45 = vadd.f32 %v312_v43, %v105_v40 }
 0x188   :  { %v273_v46 = vpop.f32.mrf.mxu0  ;;  %v378_v47 = vpop.f32.mrf.mxu1 }
 0x189   :  { %318 = vst [vmem:[%s540_s3] sm:$0xff] %v272_v44  ;;  %320 = vst [vmem:[%s540_s3 + $0x10] sm:$0xff] %v313_v45  ;;  %v274_v48 = vadd.f32 %v273_v46, %v101_v41 }
 0x18a   :  { %v275_v49 = vpop.f32.mrf.mxu0  ;;  %v315_v50 = vpop.f32.mrf.mxu1 }
 0x18b   :  { %319 = vst [vmem:[%s540_s3 + $0x8] sm:$0xff] %v274_v48 }
 0x18c   :  { %v276_v51 = vpop.f32.mrf.mxu0  ;;  %v379_v52 = vpop.f32.mrf.mxu1 }
 0x18d   :  { %325 = vsyncpa [#allocation3], 1 }
 0x18e   :  { %326 = vsyncpa [#allocation5], 1 }

</bundles_post_ra>
